<compile_context>
chip_gen: v6e
topology: v6e:2x2x1
jax: 0.10.0
libtpu: 0.0.40
codegen_flags: <defaults>
</compile_context>

<pallas_src>
import functools

import jax
import jax.numpy as jnp
from jax import lax
from jax.experimental import pallas as pl
from jax.experimental.pallas import tpu as pltpu


def _round_up(n, m):
    return ((n + m - 1) // m) * m


def _ham_resnet_kernel(x_ref, kt_ref, k_ref, b_ref, xout_ref, *, h, depth):
    """One grid step == one batch tile; the whole depth loop runs in-kernel.

    x_ref   : (Bt, Fp)         input batch tile (feature dim lane-dense / padded)
    kt_ref  : (depth, Fp, Wp)  stacked K^T, matmul dtype (bf16), resident in VMEM
    k_ref   : (depth, Wp, Fp)  stacked K,   matmul dtype (bf16), resident in VMEM
    b_ref   : (depth, 1, Wp)   stacked layer biases (f32)
    xout_ref: (Bt, Fp)         output batch tile
    """
    x0 = x_ref[...].astype(jnp.float32)                          # (Bt, Fp) f32 carry
    z0 = jnp.zeros((x0.shape[0], k_ref.shape[1]), jnp.float32)   # (Bt, Wp) f32 carry
    mm_dtype = k_ref.dtype

    def body(l, carry):
        x, z = carry
        Kt = kt_ref[l]                      # (Fp, Wp)  already matmul dtype
        K = k_ref[l]                        # (Wp, Fp)  already matmul dtype
        bl = b_ref[l]                       # (1, Wp), broadcasts over batch rows

        # z <- z - h * tanh(x @ K^T + b)   -- canonical (Bt,Fp)x(Fp,Wp) matmul.
        a1 = jnp.tanh(
            jnp.dot(x.astype(mm_dtype), Kt, preferred_element_type=jnp.float32)
            + bl
        )
        z = z - h * a1

        # x <- x + h * tanh(z @ K)         -- canonical (Bt,Wp)x(Wp,Fp) matmul.
        a2 = jnp.tanh(
            jnp.dot(z.astype(mm_dtype), K, preferred_element_type=jnp.float32)
        )
        x = x + h * a2
        return x, z

    x_final, _ = lax.fori_loop(0, depth, body, (x0, z0), unroll=True)
    xout_ref[...] = x_final.astype(xout_ref.dtype)


def hamiltonian_resnet(x, K, b, h, *, batch_tile=512, matmul_dtype=jnp.bfloat16):
    """Forward pass of HamiltonianResNet.

    x: (B, in_features); K: (depth, width, in_features); b: (depth, width) or
    (depth, 1, width); h: scalar step size.
    """
    B, F = x.shape
    depth, W, _ = K.shape
    if depth == 0:
        # No layers => identity on x (the output block would otherwise be unwritten).
        return x
    b = b.reshape(depth, 1, W)

    # Lane-dense padding: feature / width dims to multiples of 128, batch to the
    # sublane multiple (8) and then to the batch tile.  Zero padding is exact for
    # this update rule (padded rows/cols contribute nothing to the real outputs).
    Fp = _round_up(max(F, 128), 128)
    Wp = _round_up(max(W, 128), 128)
    Bt = min(_round_up(B, 8), _round_up(batch_tile, 8))
    Bp = _round_up(B, Bt)

    K32 = K.astype(jnp.float32)
    x_p = jnp.zeros((Bp, Fp), x.dtype).at[:B, :F].set(x)
    # Weights shipped pre-cast to the matmul dtype, in both orientations, so the
    # kernel's matmuls are both canonical and no weight cast happens per layer.
    k_p = jnp.zeros((depth, Wp, Fp), matmul_dtype).at[:, :W, :F].set(
        K32.astype(matmul_dtype))
    kt_p = jnp.zeros((depth, Fp, Wp), matmul_dtype).at[:, :F, :W].set(
        jnp.transpose(K32, (0, 2, 1)).astype(matmul_dtype))
    b_p = jnp.zeros((depth, 1, Wp), jnp.float32).at[:, :, :W].set(
        b.astype(jnp.float32))

    kernel = functools.partial(_ham_resnet_kernel, h=float(h), depth=depth)

    out_p = pl.pallas_call(
        kernel,
        out_shape=jax.ShapeDtypeStruct((Bp, Fp), x.dtype),
        grid_spec=pltpu.PrefetchScalarGridSpec(
            num_scalar_prefetch=0,
            grid=(Bp // Bt,),                                       # batch tiles only
            in_specs=[
                pl.BlockSpec((Bt, Fp), lambda i: (i, 0)),            # x tile
                pl.BlockSpec((depth, Fp, Wp), lambda i: (0, 0, 0)),  # all K^T
                pl.BlockSpec((depth, Wp, Fp), lambda i: (0, 0, 0)),  # all K
                pl.BlockSpec((depth, 1, Wp), lambda i: (0, 0, 0)),   # all biases
            ],
            out_specs=pl.BlockSpec((Bt, Fp), lambda i: (i, 0)),
        ),
        compiler_params=pltpu.CompilerParams(
            # Batch tiles are independent -> parallel (uses both TCs on v7x).
            dimension_semantics=("parallel",),
        ),
    )(x_p, kt_p, k_p, b_p)

    return out_p[:B, :F]


def hamiltonian_resnet_ref(x, K, b, h, matmul_dtype=jnp.float32):
    """Pure-JAX reference of the same forward pass (optionally bf16 matmuls)."""
    depth, W, _ = K.shape
    b = b.reshape(depth, 1, W)
    xf = x.astype(jnp.float32)
    z = jnp.zeros((x.shape[0], W), jnp.float32)
    for l in range(depth):
        Kl = K[l].astype(matmul_dtype)          # (W, F)
        bl = b[l].astype(jnp.float32)           # (1, W)
        z = z - h * jnp.tanh(
            jnp.dot(xf.astype(matmul_dtype), Kl.T,
                    preferred_element_type=jnp.float32) + bl)
        xf = xf + h * jnp.tanh(
            jnp.dot(z.astype(matmul_dtype), Kl,
                    preferred_element_type=jnp.float32))
    return xf.astype(x.dtype)


if __name__ == "__main__":
    # Small shapes consistent with the module: in_features, width, depth, h.
    B, in_features, width, depth, h = 8, 16, 32, 4, 0.1

    key = jax.random.PRNGKey(0)
    kx, kw, kb = jax.random.split(key, 3)

    # Deterministic nn.Linear-style init: U(-1/sqrt(in_features), 1/sqrt(in_features)).
    bound = 1.0 / jnp.sqrt(jnp.float32(in_features))
    x = jax.random.normal(kx, (B, in_features), dtype=jnp.float32)
    K = jax.random.uniform(kw, (depth, width, in_features),
                           minval=-bound, maxval=bound, dtype=jnp.float32)
    b = jax.random.uniform(kb, (depth, width),
                           minval=-bound, maxval=bound, dtype=jnp.float32)

    out = hamiltonian_resnet(x, K, b, h)
    out = jax.block_until_ready(out)
    assert out.shape == (B, in_features)

    # Tight check against a reference that mimics the kernel's bf16-matmul numerics.
    ref_bf16 = hamiltonian_resnet_ref(x, K, b, h, matmul_dtype=jnp.bfloat16)
    assert jnp.allclose(out, ref_bf16, atol=2e-3, rtol=2e-3), "mismatch vs bf16 reference"

    # Loose check against the pure-f32 semantics of the module.
    ref_f32 = hamiltonian_resnet_ref(x, K, b, h, matmul_dtype=jnp.float32)
    assert jnp.allclose(out, ref_f32, atol=2e-2, rtol=2e-2), "mismatch vs f32 reference"

    print("KERNEL_OK")
</pallas_src>

<mosaic_0001>
module attributes {stable_mosaic.version = 11 : i64} {
  func.func @_ham_resnet_kernel(%arg0: i32, %arg1: memref<8x128xf32, #tpu.memory_space<vmem>>, %arg2: memref<4x128x128xbf16, #tpu.memory_space<vmem>>, %arg3: memref<4x128x128xbf16, #tpu.memory_space<vmem>>, %arg4: memref<4x1x128xf32, #tpu.memory_space<vmem>>, %arg5: memref<8x128xf32, #tpu.memory_space<vmem>>) attributes {dimension_semantics = [#tpu.dimension_semantics<parallel>], iteration_bounds = array<i64: 1>, scalar_prefetch = 0 : i64, scratch_operands = 0 : i64, tpu.core_type = #tpu.core_type<tc>, window_params = [{transform_indices = @transform_0, window_bounds = array<i64: 8, 128>}, {pipeline_mode = #tpu.pipeline_mode<synchronous>, transform_indices = @transform_1, window_bounds = array<i64: 4, 128, 128>}, {pipeline_mode = #tpu.pipeline_mode<synchronous>, transform_indices = @transform_2, window_bounds = array<i64: 4, 128, 128>}, {pipeline_mode = #tpu.pipeline_mode<synchronous>, transform_indices = @transform_3, window_bounds = array<i64: 4, 1, 128>}, {transform_indices = @transform_4, window_bounds = array<i64: 8, 128>}]} {
    %c0 = arith.constant 0 : index
    %c0_0 = arith.constant 0 : index
    %0 = vector.load %arg1[%c0, %c0_0] : memref<8x128xf32, #tpu.memory_space<vmem>>, vector<8x128xf32>
    %cst = arith.constant 0.000000e+00 : f32
    %1 = vector.broadcast %cst : f32 to vector<8x128xf32>
    %c0_i32 = arith.constant 0 : i32
    %2 = arith.index_cast %c0_i32 : i32 to index
    %c0_1 = arith.constant 0 : index
    %c0_2 = arith.constant 0 : index
    %3 = vector.load %arg2[%2, %c0_1, %c0_2] : memref<4x128x128xbf16, #tpu.memory_space<vmem>>, vector<1x128x128xbf16>
    %4 = vector.shape_cast %3 : vector<1x128x128xbf16> to vector<128x128xbf16>
    %5 = arith.index_cast %c0_i32 : i32 to index
    %c0_3 = arith.constant 0 : index
    %c0_4 = arith.constant 0 : index
    %6 = vector.load %arg3[%5, %c0_3, %c0_4] : memref<4x128x128xbf16, #tpu.memory_space<vmem>>, vector<1x128x128xbf16>
    %7 = vector.shape_cast %6 : vector<1x128x128xbf16> to vector<128x128xbf16>
    %8 = arith.index_cast %c0_i32 : i32 to index
    %c0_5 = arith.constant 0 : index
    %c0_6 = arith.constant 0 : index
    %9 = vector.load %arg4[%8, %c0_5, %c0_6] : memref<4x1x128xf32, #tpu.memory_space<vmem>>, vector<1x1x128xf32>
    %10 = vector.shape_cast %9 : vector<1x1x128xf32> to vector<1x128xf32>
    %11 = arith.truncf %0 : vector<8x128xf32> to vector<8x128xbf16>
    %cst_7 = arith.constant dense<0.000000e+00> : vector<8x128xf32>
    %12 = tpu.matmul %11, %4, %cst_7 {dimension_numbers = #tpu.dot_dimension_numbers<[1], [0], [0], [1], [0, 0, 1, 1], [], []>} : vector<8x128xbf16>, vector<128x128xbf16>, vector<8x128xf32> -> vector<8x128xf32>
    %13 = vector.broadcast %10 : vector<1x128xf32> to vector<8x128xf32>
    %14 = arith.addf %12, %13 : vector<8x128xf32>
    %15 = math.tanh %14 : vector<8x128xf32>
    %cst_8 = arith.constant 1.000000e-01 : f32
    %16 = vector.broadcast %cst_8 : f32 to vector<8x128xf32>
    %17 = arith.mulf %16, %15 : vector<8x128xf32>
    %18 = arith.subf %1, %17 : vector<8x128xf32>
    %19 = arith.truncf %18 : vector<8x128xf32> to vector<8x128xbf16>
    %cst_9 = arith.constant dense<0.000000e+00> : vector<8x128xf32>
    %20 = tpu.matmul %19, %7, %cst_9 {dimension_numbers = #tpu.dot_dimension_numbers<[1], [0], [0], [1], [0, 0, 1, 1], [], []>} : vector<8x128xbf16>, vector<128x128xbf16>, vector<8x128xf32> -> vector<8x128xf32>
    %21 = math.tanh %20 : vector<8x128xf32>
    %cst_10 = arith.constant 1.000000e-01 : f32
    %22 = vector.broadcast %cst_10 : f32 to vector<8x128xf32>
    %23 = arith.mulf %22, %21 : vector<8x128xf32>
    %24 = arith.addf %0, %23 : vector<8x128xf32>
    %c1_i32 = arith.constant 1 : i32
    %25 = arith.index_cast %c1_i32 : i32 to index
    %c0_11 = arith.constant 0 : index
    %c0_12 = arith.constant 0 : index
    %26 = vector.load %arg2[%25, %c0_11, %c0_12] : memref<4x128x128xbf16, #tpu.memory_space<vmem>>, vector<1x128x128xbf16>
    %27 = vector.shape_cast %26 : vector<1x128x128xbf16> to vector<128x128xbf16>
    %28 = arith.index_cast %c1_i32 : i32 to index
    %c0_13 = arith.constant 0 : index
    %c0_14 = arith.constant 0 : index
    %29 = vector.load %arg3[%28, %c0_13, %c0_14] : memref<4x128x128xbf16, #tpu.memory_space<vmem>>, vector<1x128x128xbf16>
    %30 = vector.shape_cast %29 : vector<1x128x128xbf16> to vector<128x128xbf16>
    %31 = arith.index_cast %c1_i32 : i32 to index
    %c0_15 = arith.constant 0 : index
    %c0_16 = arith.constant 0 : index
    %32 = vector.load %arg4[%31, %c0_15, %c0_16] : memref<4x1x128xf32, #tpu.memory_space<vmem>>, vector<1x1x128xf32>
    %33 = vector.shape_cast %32 : vector<1x1x128xf32> to vector<1x128xf32>
    %34 = arith.truncf %24 : vector<8x128xf32> to vector<8x128xbf16>
    %cst_17 = arith.constant dense<0.000000e+00> : vector<8x128xf32>
    %35 = tpu.matmul %34, %27, %cst_17 {dimension_numbers = #tpu.dot_dimension_numbers<[1], [0], [0], [1], [0, 0, 1, 1], [], []>} : vector<8x128xbf16>, vector<128x128xbf16>, vector<8x128xf32> -> vector<8x128xf32>
    %36 = vector.broadcast %33 : vector<1x128xf32> to vector<8x128xf32>
    %37 = arith.addf %35, %36 : vector<8x128xf32>
    %38 = math.tanh %37 : vector<8x128xf32>
    %cst_18 = arith.constant 1.000000e-01 : f32
    %39 = vector.broadcast %cst_18 : f32 to vector<8x128xf32>
    %40 = arith.mulf %39, %38 : vector<8x128xf32>
    %41 = arith.subf %18, %40 : vector<8x128xf32>
    %42 = arith.truncf %41 : vector<8x128xf32> to vector<8x128xbf16>
    %cst_19 = arith.constant dense<0.000000e+00> : vector<8x128xf32>
    %43 = tpu.matmul %42, %30, %cst_19 {dimension_numbers = #tpu.dot_dimension_numbers<[1], [0], [0], [1], [0, 0, 1, 1], [], []>} : vector<8x128xbf16>, vector<128x128xbf16>, vector<8x128xf32> -> vector<8x128xf32>
    %44 = math.tanh %43 : vector<8x128xf32>
    %cst_20 = arith.constant 1.000000e-01 : f32
    %45 = vector.broadcast %cst_20 : f32 to vector<8x128xf32>
    %46 = arith.mulf %45, %44 : vector<8x128xf32>
    %47 = arith.addf %24, %46 : vector<8x128xf32>
    %c2_i32 = arith.constant 2 : i32
    %48 = arith.index_cast %c2_i32 : i32 to index
    %c0_21 = arith.constant 0 : index
    %c0_22 = arith.constant 0 : index
    %49 = vector.load %arg2[%48, %c0_21, %c0_22] : memref<4x128x128xbf16, #tpu.memory_space<vmem>>, vector<1x128x128xbf16>
    %50 = vector.shape_cast %49 : vector<1x128x128xbf16> to vector<128x128xbf16>
    %51 = arith.index_cast %c2_i32 : i32 to index
    %c0_23 = arith.constant 0 : index
    %c0_24 = arith.constant 0 : index
    %52 = vector.load %arg3[%51, %c0_23, %c0_24] : memref<4x128x128xbf16, #tpu.memory_space<vmem>>, vector<1x128x128xbf16>
    %53 = vector.shape_cast %52 : vector<1x128x128xbf16> to vector<128x128xbf16>
    %54 = arith.index_cast %c2_i32 : i32 to index
    %c0_25 = arith.constant 0 : index
    %c0_26 = arith.constant 0 : index
    %55 = vector.load %arg4[%54, %c0_25, %c0_26] : memref<4x1x128xf32, #tpu.memory_space<vmem>>, vector<1x1x128xf32>
    %56 = vector.shape_cast %55 : vector<1x1x128xf32> to vector<1x128xf32>
    %57 = arith.truncf %47 : vector<8x128xf32> to vector<8x128xbf16>
    %cst_27 = arith.constant dense<0.000000e+00> : vector<8x128xf32>
    %58 = tpu.matmul %57, %50, %cst_27 {dimension_numbers = #tpu.dot_dimension_numbers<[1], [0], [0], [1], [0, 0, 1, 1], [], []>} : vector<8x128xbf16>, vector<128x128xbf16>, vector<8x128xf32> -> vector<8x128xf32>
    %59 = vector.broadcast %56 : vector<1x128xf32> to vector<8x128xf32>
    %60 = arith.addf %58, %59 : vector<8x128xf32>
    %61 = math.tanh %60 : vector<8x128xf32>
    %cst_28 = arith.constant 1.000000e-01 : f32
    %62 = vector.broadcast %cst_28 : f32 to vector<8x128xf32>
    %63 = arith.mulf %62, %61 : vector<8x128xf32>
    %64 = arith.subf %41, %63 : vector<8x128xf32>
    %65 = arith.truncf %64 : vector<8x128xf32> to vector<8x128xbf16>
    %cst_29 = arith.constant dense<0.000000e+00> : vector<8x128xf32>
    %66 = tpu.matmul %65, %53, %cst_29 {dimension_numbers = #tpu.dot_dimension_numbers<[1], [0], [0], [1], [0, 0, 1, 1], [], []>} : vector<8x128xbf16>, vector<128x128xbf16>, vector<8x128xf32> -> vector<8x128xf32>
    %67 = math.tanh %66 : vector<8x128xf32>
    %cst_30 = arith.constant 1.000000e-01 : f32
    %68 = vector.broadcast %cst_30 : f32 to vector<8x128xf32>
    %69 = arith.mulf %68, %67 : vector<8x128xf32>
    %70 = arith.addf %47, %69 : vector<8x128xf32>
    %c3_i32 = arith.constant 3 : i32
    %71 = arith.index_cast %c3_i32 : i32 to index
    %c0_31 = arith.constant 0 : index
    %c0_32 = arith.constant 0 : index
    %72 = vector.load %arg2[%71, %c0_31, %c0_32] : memref<4x128x128xbf16, #tpu.memory_space<vmem>>, vector<1x128x128xbf16>
    %73 = vector.shape_cast %72 : vector<1x128x128xbf16> to vector<128x128xbf16>
    %74 = arith.index_cast %c3_i32 : i32 to index
    %c0_33 = arith.constant 0 : index
    %c0_34 = arith.constant 0 : index
    %75 = vector.load %arg3[%74, %c0_33, %c0_34] : memref<4x128x128xbf16, #tpu.memory_space<vmem>>, vector<1x128x128xbf16>
    %76 = vector.shape_cast %75 : vector<1x128x128xbf16> to vector<128x128xbf16>
    %77 = arith.index_cast %c3_i32 : i32 to index
    %c0_35 = arith.constant 0 : index
    %c0_36 = arith.constant 0 : index
    %78 = vector.load %arg4[%77, %c0_35, %c0_36] : memref<4x1x128xf32, #tpu.memory_space<vmem>>, vector<1x1x128xf32>
    %79 = vector.shape_cast %78 : vector<1x1x128xf32> to vector<1x128xf32>
    %80 = arith.truncf %70 : vector<8x128xf32> to vector<8x128xbf16>
    %cst_37 = arith.constant dense<0.000000e+00> : vector<8x128xf32>
    %81 = tpu.matmul %80, %73, %cst_37 {dimension_numbers = #tpu.dot_dimension_numbers<[1], [0], [0], [1], [0, 0, 1, 1], [], []>} : vector<8x128xbf16>, vector<128x128xbf16>, vector<8x128xf32> -> vector<8x128xf32>
    %82 = vector.broadcast %79 : vector<1x128xf32> to vector<8x128xf32>
    %83 = arith.addf %81, %82 : vector<8x128xf32>
    %84 = math.tanh %83 : vector<8x128xf32>
    %cst_38 = arith.constant 1.000000e-01 : f32
    %85 = vector.broadcast %cst_38 : f32 to vector<8x128xf32>
    %86 = arith.mulf %85, %84 : vector<8x128xf32>
    %87 = arith.subf %64, %86 : vector<8x128xf32>
    %88 = arith.truncf %87 : vector<8x128xf32> to vector<8x128xbf16>
    %cst_39 = arith.constant dense<0.000000e+00> : vector<8x128xf32>
    %89 = tpu.matmul %88, %76, %cst_39 {dimension_numbers = #tpu.dot_dimension_numbers<[1], [0], [0], [1], [0, 0, 1, 1], [], []>} : vector<8x128xbf16>, vector<128x128xbf16>, vector<8x128xf32> -> vector<8x128xf32>
    %90 = math.tanh %89 : vector<8x128xf32>
    %cst_40 = arith.constant 1.000000e-01 : f32
    %91 = vector.broadcast %cst_40 : f32 to vector<8x128xf32>
    %92 = arith.mulf %91, %90 : vector<8x128xf32>
    %93 = arith.addf %70, %92 : vector<8x128xf32>
    %c4_i32 = arith.constant 4 : i32
    %c0_41 = arith.constant 0 : index
    %c0_42 = arith.constant 0 : index
    %94 = vector.load %arg5[%c0_41, %c0_42] : memref<8x128xf32, #tpu.memory_space<vmem>>, vector<8x128xf32>
    tpu.vector_store %arg5[%c0_41, %c0_42], %93 {strides = array<i32>} : memref<8x128xf32, #tpu.memory_space<vmem>>, vector<8x128xf32>,
    return
  }
  func.func @transform_0(%arg0: i32) -> (i32, i32) {
    %c0_i32 = arith.constant 0 : i32
    %c0_i32_0 = arith.constant 0 : i32
    return %arg0, %c0_i32 : i32, i32
  }
  func.func @transform_1(%arg0: i32) -> (i32, i32, i32) {
    %c0_i32 = arith.constant 0 : i32
    %c0_i32_0 = arith.constant 0 : i32
    %c0_i32_1 = arith.constant 0 : i32
    %c0_i32_2 = arith.constant 0 : i32
    return %c0_i32, %c0_i32_0, %c0_i32_1 : i32, i32, i32
  }
  func.func @transform_2(%arg0: i32) -> (i32, i32, i32) {
    %c0_i32 = arith.constant 0 : i32
    %c0_i32_0 = arith.constant 0 : i32
    %c0_i32_1 = arith.constant 0 : i32
    %c0_i32_2 = arith.constant 0 : i32
    return %c0_i32, %c0_i32_0, %c0_i32_1 : i32, i32, i32
  }
  func.func @transform_3(%arg0: i32) -> (i32, i32, i32) {
    %c0_i32 = arith.constant 0 : i32
    %c0_i32_0 = arith.constant 0 : i32
    %c0_i32_1 = arith.constant 0 : i32
    %c0_i32_2 = arith.constant 0 : i32
    return %c0_i32, %c0_i32_0, %c0_i32_1 : i32, i32, i32
  }
  func.func @transform_4(%arg0: i32) -> (i32, i32) {
    %c0_i32 = arith.constant 0 : i32
    %c0_i32_0 = arith.constant 0 : i32
    return %arg0, %c0_i32 : i32, i32
  }
}

</mosaic_0001>

<bundles_post_ra>
// kernel: tpu_custom_call.1
= control target key start
LH: loop header
LB: loop body
LE: loop exit
PB: predicated region body
PF: predicated region fallthrough
CT: control target
= control target key end

     0   :  { %9 = vsyncpa [#allocation3], 0  ;;  %s1616_s0 = inlined_call_operand.hbm [shape: f32[8,128], index: 0, kind: input, shape index: {}]   ;;  %s1617_s1 = inlined_call_operand.hbm [shape: bf16[4,128,128], index: 1, kind: input, shape index: {}]   ;;  %s1618_s2 = inlined_call_operand.hbm [shape: bf16[4,128,128], index: 2, kind: input, shape index: {}]   ;;  %s1619_s3 = inlined_call_operand.vmem [shape: f32[4,1,128], index: 3, kind: input, shape index: {}]   ;;  %s1620_s4 = inlined_call_operand.hbm [shape: f32[8,128], index: 4, kind: output, shape index: {}]  }
   0x1   :  { %10 = vsyncpa [#allocation6], 0 }
   0x2   :  { %11 = vsyncpa [#allocation4], 0  ;;  %s1454_s15 = smov [#allocation5]  }
   0x3   :  { %s27_s16 = sshll.u32 %s1454_s15, 4  ;;  %s28_s16 = int_to_ptr.vmem [resolvable:$true] %s27_s16 }
   0x4   :  { %s1376_s17 = scalar_lea.vmem %s28_s16, 4096  ;;  %p1381_p1 = scmp.lt.s32.totalorder %s28_s16, %s28_s16 }
   0x5   :  { %p1377_p0 = scmp.ne.s32.totalorder %s28_s16, %s1376_s17  ;;  %p1382_p2 = scmp.lt.s32.totalorder %s1376_s17, %s1376_s17 }
   0x7   :  { %p1383_p3 = por %p1382_p2, %p1381_p1 }
   0x9   :  { %p1384_p4 = pnand %p1383_p3, %p1377_p0 }
   0xb   :  { %1387 = shalt.err (!%p1384_p4)
}
   0xc   :  { %s1455_s18 = smov 64   ;;  %s1456_s19 = smov 4  }
   0xd   :  { %33 = dma.hbm_to_vmem [thread:$0]  %s1617_s1, 4096, %s28_s16, [#allocation6], %s1455_s18, %s1455_s18, %s1456_s19  }
   0xe   :  { %s1457_s22 = smov [#allocation2]   ;;  %s1458_s24 = smov [#allocation7]  }
   0xf   :  { %s18_s23 = sshll.u32 %s1457_s22, 4  ;;  %s39_s25 = sshll.u32 %s1458_s24, 4  ;;  %s19_s23 = int_to_ptr.vmem [resolvable:$true] %s18_s23  ;;  %s40_s25 = int_to_ptr.vmem [resolvable:$true] %s39_s25 }
  0x10   :  { %s1396_s26 = scalar_lea.vmem %s19_s23, 128  ;;  %p1401_p6 = scmp.lt.s32.totalorder %s19_s23, %s19_s23 }
  0x11   :  { %p1397_p5 = scmp.ne.s32.totalorder %s19_s23, %s1396_s26  ;;  %p1402_p7 = scmp.lt.s32.totalorder %s1396_s26, %s1396_s26 }
  0x13   :  { %p1403_p8 = por %p1402_p7, %p1401_p6 }
  0x15   :  { %p1404_p9 = pnand %p1403_p8, %p1397_p5 }
  0x17   :  { %1407 = shalt.err (!%p1404_p9)
}
  0x18   :  { %21 = dma.hbm_to_vmem [thread:$0]  %s1616_s0, 128, %s19_s23, [#allocation3]  }
  0x19   :  { %s1416_s29 = scalar_lea.vmem %s40_s25, 4096  ;;  %p1421_p11 = scmp.lt.s32.totalorder %s40_s25, %s40_s25 }
  0x1a   :  { %p1417_p10 = scmp.ne.s32.totalorder %s40_s25, %s1416_s29  ;;  %p1422_p12 = scmp.lt.s32.totalorder %s1416_s29, %s1416_s29 }
  0x1c   :  { %p1423_p13 = por %p1422_p12, %p1421_p11 }
  0x1e   :  { %p1424_p0 = pnand %p1423_p13, %p1417_p10 }
  0x20   :  { %1427 = shalt.err (!%p1424_p0)
}
  0x21   :  { %45 = dma.hbm_to_vmem [thread:$0]  %s1618_s2, 4096, %s40_s25, [#allocation6], %s1455_s18, %s1455_s18, %s1456_s19  }
  0x22   :  { %1448 = dma.done.wait [#allocation3], 128  }
  0x23   :  { %1449 = vsyncadd [#allocation3], 4294967168 }
  0x24   :  { %1450 = dma.done.wait [#allocation6], 8192  }
  0x25   :  { %1451 = vsyncadd [#allocation6], 4294959104  ;;  %v1459_v0 = vmov 0.0   ;;  %vm1460_vm0 = vmmov 0   ;;  %v1288_v1 = vld [vmem:[#allocation5 + $0x38] sm:$0xff]   ;;  %v1289_v2 = vld [vmem:[#allocation5 + $0x30] sm:$0xff]  }
  0x26   :  { %1120 = vmatprep.subr.bf16.mxu0 %v1459_v0  ;;  %1136 = vmatprep.mubr.msk.bf16.mxu0 %vm1460_vm0, %v1459_v0  ;;  %v1290_v3 = vld [vmem:[#allocation5 + $0x28] sm:$0xff]   ;;  %v1296_v4 = vld [vmem:[#allocation7 + $0x38] sm:$0xff]   ;;  %v1291_v5 = vld [vmem:[#allocation5 + $0x20] sm:$0xff]   ;;  %s1461_s11 = smov [#allocation8]  }
  0x27   :  { %1140 = vmatprep.subr.bf16.mxu1 %v1459_v0  ;;  %1156 = vmatprep.mubr.msk.bf16.mxu1 %vm1460_vm0, %v1459_v0  ;;  %v1297_v6 = vld [vmem:[#allocation7 + $0x30] sm:$0xff]   ;;  %v1292_v7 = vld [vmem:[#allocation5 + $0x18] sm:$0xff]   ;;  %v1294_v9 = vld [vmem:[#allocation5 + $0x8] sm:$0xff]   ;;  %s967_s12 = sshll.u32 %s1461_s11, 4  ;;  %s968_s12 = int_to_ptr.vmem [resolvable:$true] %s967_s12 }
  0x28   :  { %1121 = vmatpush3.bf16.msra.mxu0 %v1288_v1  ;;  %1141 = vmatpush3.bf16.msra.mxu1 %v1296_v4  ;;  %v1293_v8 = vld [vmem:[#allocation5 + $0x10] sm:$0xff]   ;;  %v1295_v10 = vld [vmem:[#allocation5] sm:$0xff]   ;;  %v1510_v11 = vld [vmem:[#allocation2] sm:$0xff]  ;;  %p1433_p2 = scmp.lt.s32.totalorder %s968_s12, %s968_s12 }
  0x29   :  { %1122 = vmatprep.subr.bf16.mxu0 %v1459_v0  ;;  %1142 = vmatprep.subr.bf16.mxu1 %v1459_v0  ;;  %v92_v12 = vpack.c.bf16 %v1510_v11, %v1510_v11  ;;  %v1298_v13 = vld [vmem:[#allocation7 + $0x28] sm:$0xff]   ;;  %v1299_v14 = vld [vmem:[#allocation7 + $0x20] sm:$0xff]   ;;  %v1300_v15 = vld [vmem:[#allocation7 + $0x18] sm:$0xff]  }
  0x2a   :  { %v1301_v16 = vld [vmem:[#allocation7 + $0x10] sm:$0xff]   ;;  %v1302_v17 = vld [vmem:[#allocation7 + $0x8] sm:$0xff]   ;;  %v1303_v18 = vld [vmem:[#allocation7] sm:$0xff]  }
  0x2b   :  { %v1304_v19 = vld [vmem:[#allocation5 + $0x78] sm:$0xff]   ;;  %v1305_v20 = vld [vmem:[#allocation5 + $0x70] sm:$0xff]   ;;  %v1306_v21 = vld [vmem:[#allocation5 + $0x68] sm:$0xff]  }
  0x2c   :  { %1123 = vmatpush3.bf16.msra.mxu0 %v1289_v2  ;;  %1143 = vmatpush3.bf16.msra.mxu1 %v1297_v6  ;;  %v977_v22 = vld [vmem:[%s1619_s3] ss:$0 sm:$0xff]  ;;  %v1307_v32 = vld [vmem:[#allocation5 + $0x60] sm:$0xff]   ;;  %v1309_v34 = vld [vmem:[#allocation5 + $0x50] sm:$0xff]  }
  0x2d   :  { %1124 = vmatprep.subr.bf16.mxu0 %v1459_v0  ;;  %1144 = vmatprep.subr.bf16.mxu1 %v1459_v0  ;;  %v1308_v33 = vld [vmem:[#allocation5 + $0x58] sm:$0xff]   ;;  %v1310_v35 = vld [vmem:[#allocation5 + $0x48] sm:$0xff]   ;;  %v1311_v36 = vld [vmem:[#allocation5 + $0x40] sm:$0xff]  }
  0x2e   :  { %v1312_v37 = vld [vmem:[#allocation7 + $0x78] sm:$0xff]   ;;  %v1313_v38 = vld [vmem:[#allocation7 + $0x70] sm:$0xff]   ;;  %v1314_v47 = vld [vmem:[#allocation7 + $0x68] sm:$0xff]  }
  0x2f   :  { %v1315_v48 = vld [vmem:[#allocation7 + $0x60] sm:$0xff]   ;;  %v1316_v49 = vld [vmem:[#allocation7 + $0x58] sm:$0xff]   ;;  %v1317_v50 = vld [vmem:[#allocation7 + $0x50] sm:$0xff]  }
  0x30   :  { %1125 = vmatpush3.bf16.msra.mxu0 %v1290_v3  ;;  %1145 = vmatpush3.bf16.msra.mxu1 %v1298_v13  ;;  %v1318_v51 = vld [vmem:[#allocation7 + $0x48] sm:$0xff]   ;;  %v1319_v52 = vld [vmem:[#allocation7 + $0x40] sm:$0xff]   ;;  %v1320_v53 = vld [vmem:[#allocation5 + $0xb8] sm:$0xff]  }
  0x31   :  { %1126 = vmatprep.subr.bf16.mxu0 %v1459_v0  ;;  %1146 = vmatprep.subr.bf16.mxu1 %v1459_v0  ;;  %v1321_v54 = vld [vmem:[#allocation5 + $0xb0] sm:$0xff]   ;;  %v1322_v55 = vld [vmem:[#allocation5 + $0xa8] sm:$0xff]   ;;  %v995_v56 = vld [vmem:[%s1619_s3 + $0x1] ss:$0 sm:$0xff] }
  0x32   :  { %v1323_v3 = vld [vmem:[#allocation5 + $0xa0] sm:$0xff]   ;;  %v1324_v4 = vld [vmem:[#allocation5 + $0x98] sm:$0xff]   ;;  %v1326_v6 = vld [vmem:[#allocation5 + $0x88] sm:$0xff]  }
  0x34   :  { %1127 = vmatpush3.bf16.msra.mxu0 %v1291_v5  ;;  %1147 = vmatpush3.bf16.msra.mxu1 %v1299_v14  ;;  %v1325_v5 = vld [vmem:[#allocation5 + $0x90] sm:$0xff]  }
  0x35   :  { %1128 = vmatprep.subr.bf16.mxu0 %v1459_v0  ;;  %1148 = vmatprep.subr.bf16.mxu1 %v1459_v0 }
  0x38   :  { %1129 = vmatpush3.bf16.msra.mxu0 %v1292_v7  ;;  %1149 = vmatpush3.bf16.msra.mxu1 %v1300_v15  ;;  %v1327_v7 = vld [vmem:[#allocation5 + $0x80] sm:$0xff]  }
  0x39   :  { %1130 = vmatprep.subr.bf16.mxu0 %v1459_v0  ;;  %1150 = vmatprep.subr.bf16.mxu1 %v1459_v0 }
  0x3c   :  { %1131 = vmatpush3.bf16.msra.mxu0 %v1293_v8  ;;  %1151 = vmatpush3.bf16.msra.mxu1 %v1301_v16  ;;  %v1328_v8 = vld [vmem:[#allocation7 + $0xb8] sm:$0xff]  }
  0x3d   :  { %1132 = vmatprep.subr.bf16.mxu0 %v1459_v0  ;;  %1152 = vmatprep.subr.bf16.mxu1 %v1459_v0 }
  0x40   :  { %1133 = vmatpush3.bf16.msra.mxu0 %v1294_v9  ;;  %1153 = vmatpush3.bf16.msra.mxu1 %v1302_v17  ;;  %v1329_v9 = vld [vmem:[#allocation7 + $0xb0] sm:$0xff]  }
  0x41   :  { %1134 = vmatprep.subr.bf16.mxu0 %v1459_v0  ;;  %1154 = vmatprep.subr.bf16.mxu1 %v1459_v0 }
  0x44   :  { %1135 = vmatpush3.bf16.msra.mxu0 %v1295_v10  ;;  %1155 = vmatpush3.bf16.msra.mxu1 %v1303_v18  ;;  %v1330_v18 = vld [vmem:[#allocation7 + $0xa8] sm:$0xff]  }
  0x45   :  { %1160 = vmatprep.subr.bf16.mxu0 %v1459_v0  ;;  %1180 = vmatprep.subr.bf16.mxu1 %v1459_v0 }
  0x47   :  { %1137 = vmatmul.mubr.bf16.vlgmr.msra.gmra.mxu0 %v92_v12 }
  0x48   :  { %1176 = vmatprep.mubr.msk.bf16.mxu0 %vm1460_vm0, %v1459_v0  ;;  %1161 = vmatpush3.bf16.msra.mxu0 %v1304_v19  ;;  %v1331_v19 = vld [vmem:[#allocation7 + $0xa0] sm:$0xff]  }
  0x49   :  { %1162 = vmatprep.subr.bf16.mxu0 %v1459_v0 }
  0x4c   :  { %1163 = vmatpush3.bf16.msra.mxu0 %v1305_v20  ;;  %v1332_v20 = vld [vmem:[#allocation7 + $0x98] sm:$0xff]  }
  0x4d   :  { %1164 = vmatprep.subr.bf16.mxu0 %v1459_v0 }
  0x50   :  { %1165 = vmatpush3.bf16.msra.mxu0 %v1306_v21  ;;  %v1333_v21 = vld [vmem:[#allocation7 + $0x90] sm:$0xff]  }
  0x51   :  { %1166 = vmatprep.subr.bf16.mxu0 %v1459_v0 }
  0x54   :  { %1167 = vmatpush3.bf16.msra.mxu0 %v1307_v32 }
  0x55   :  { %1168 = vmatprep.subr.bf16.mxu0 %v1459_v0 }
  0x58   :  { %1169 = vmatpush3.bf16.msra.mxu0 %v1308_v33 }
  0x59   :  { %1170 = vmatprep.subr.bf16.mxu0 %v1459_v0 }
  0x5c   :  { %1171 = vmatpush3.bf16.msra.mxu0 %v1309_v34 }
  0x5d   :  { %1172 = vmatprep.subr.bf16.mxu0 %v1459_v0 }
  0x60   :  { %1173 = vmatpush3.bf16.msra.mxu0 %v1310_v35 }
  0x61   :  { %1174 = vmatprep.subr.bf16.mxu0 %v1459_v0 }
  0x64   :  { %1175 = vmatpush3.bf16.msra.mxu0 %v1311_v36 }
  0x65   :  { %1200 = vmatprep.subr.bf16.mxu0 %v1459_v0 }
 0x107   :  { %v181_v23 = vpop.f32.mrf.mxu0 }
 0x108   :  { %v182_v24 = vadd.f32 %v977_v22, %v181_v23  ;;  %v1334_v22 = vld [vmem:[#allocation7 + $0x88] sm:$0xff]   ;;  %v1335_v23 = vld [vmem:[#allocation7 + $0x80] sm:$0xff]  }
 0x109   :  { %v1138_v25 = vpop.f32.mrf.mxu0 }
 0x10a   :  { %1352 = vtanh.f32 %v182_v24  ;;  %v1336_v24 = vld [vmem:[#allocation5 + $0xf8] sm:$0xff]   ;;  %v1337_v25 = vld [vmem:[#allocation5 + $0xf0] sm:$0xff]  }
 0x10b   :  { %v184_v26 = vpop.f32.mrf.mxu0 }
 0x10c   :  { %v1338_v26 = vld [vmem:[#allocation5 + $0xe8] sm:$0xff]  }
 0x10d   :  { %v1139_v27 = vpop.f32.mrf.mxu0 }
 0x10e   :  { %v1013_v27 = vld [vmem:[%s1619_s3 + $0x2] ss:$0 sm:$0xff] }
 0x117   :  { %v1353_v28 = vpop.eup %1352 }
 0x118   :  { %v188_v29 = vmul.f32 0.1, %v1353_v28 }
 0x11a   :  { %v1530_v30 = vsub.f32 0.0, %v188_v29 }
 0x11c   :  { %v190_v31 = vpack.c.bf16 %v1530_v30, %v1530_v30 }
 0x11e   :  { %1157 = vmatmul.mubr.bf16.vlgmr.msra.gmra.mxu1 %v190_v31 }
 0x11f   :  { %1196 = vmatprep.mubr.msk.bf16.mxu1 %vm1460_vm0, %v1459_v0  ;;  %1181 = vmatpush3.bf16.msra.mxu1 %v1312_v37  ;;  %v1339_v37 = vld [vmem:[#allocation5 + $0xe0] sm:$0xff]  }
 0x120   :  { %1182 = vmatprep.subr.bf16.mxu1 %v1459_v0 }
 0x123   :  { %1183 = vmatpush3.bf16.msra.mxu1 %v1313_v38  ;;  %v1340_v38 = vld [vmem:[#allocation5 + $0xd8] sm:$0xff]  }
 0x124   :  { %1184 = vmatprep.subr.bf16.mxu1 %v1459_v0 }
 0x127   :  { %1185 = vmatpush3.bf16.msra.mxu1 %v1314_v47 }
 0x128   :  { %1186 = vmatprep.subr.bf16.mxu1 %v1459_v0 }
 0x12b   :  { %1187 = vmatpush3.bf16.msra.mxu1 %v1315_v48 }
 0x12c   :  { %1188 = vmatprep.subr.bf16.mxu1 %v1459_v0 }
 0x12f   :  { %1189 = vmatpush3.bf16.msra.mxu1 %v1316_v49 }
 0x130   :  { %1190 = vmatprep.subr.bf16.mxu1 %v1459_v0 }
 0x133   :  { %1191 = vmatpush3.bf16.msra.mxu1 %v1317_v50 }
 0x134   :  { %1192 = vmatprep.subr.bf16.mxu1 %v1459_v0 }
 0x137   :  { %1193 = vmatpush3.bf16.msra.mxu1 %v1318_v51 }
 0x138   :  { %1194 = vmatprep.subr.bf16.mxu1 %v1459_v0 }
 0x13b   :  { %1195 = vmatpush3.bf16.msra.mxu1 %v1319_v52  ;;  %v1346_v52 = vld [vmem:[#allocation7 + $0xe8] sm:$0xff]  }
 0x13c   :  { %1220 = vmatprep.subr.bf16.mxu1 %v1459_v0 }
 0x1de   :  { %v273_v39 = vpop.f32.mrf.mxu1 }
 0x1df   :  { %1354 = vtanh.f32 %v273_v39  ;;  %v1341_v39 = vld [vmem:[#allocation5 + $0xd0] sm:$0xff]  }
 0x1e0   :  { %v1158_v40 = vpop.f32.mrf.mxu1 }
 0x1e1   :  { %v1342_v40 = vld [vmem:[#allocation5 + $0xc8] sm:$0xff]  }
 0x1e2   :  { %v276_v41 = vpop.f32.mrf.mxu1 }
 0x1e3   :  { %v1343_v41 = vld [vmem:[#allocation5 + $0xc0] sm:$0xff]  }
 0x1e4   :  { %v1159_v42 = vpop.f32.mrf.mxu1 }
 0x1e5   :  { %v1344_v42 = vld [vmem:[#allocation7 + $0xf8] sm:$0xff]  }
 0x1ec   :  { %v1355_v43 = vpop.eup %1354 }
 0x1ed   :  { %v280_v44 = vmul.f32 0.1, %v1355_v43  ;;  %v1345_v43 = vld [vmem:[#allocation7 + $0xf0] sm:$0xff]  }
 0x1ef   :  { %v1544_v45 = vadd.f32 %v280_v44, %v1510_v11 }
 0x1f1   :  { %v318_v46 = vpack.c.bf16 %v1544_v45, %v1544_v45 }
 0x1f3   :  { %1177 = vmatmul.mubr.bf16.vlgmr.msra.gmra.mxu0 %v318_v46 }
 0x1f4   :  { %1216 = vmatprep.mubr.msk.bf16.mxu0 %vm1460_vm0, %v1459_v0  ;;  %1201 = vmatpush3.bf16.msra.mxu0 %v1320_v53  ;;  %v1347_v53 = vld [vmem:[#allocation7 + $0xe0] sm:$0xff]  }
 0x1f5   :  { %1202 = vmatprep.subr.bf16.mxu0 %v1459_v0 }
 0x1f8   :  { %1203 = vmatpush3.bf16.msra.mxu0 %v1321_v54  ;;  %v1348_v54 = vld [vmem:[#allocation7 + $0xd8] sm:$0xff]  }
 0x1f9   :  { %1204 = vmatprep.subr.bf16.mxu0 %v1459_v0 }
 0x1fc   :  { %1205 = vmatpush3.bf16.msra.mxu0 %v1322_v55  ;;  %v1349_v55 = vld [vmem:[#allocation7 + $0xd0] sm:$0xff]  }
 0x1fd   :  { %1206 = vmatprep.subr.bf16.mxu0 %v1459_v0 }
 0x200   :  { %1207 = vmatpush3.bf16.msra.mxu0 %v1323_v3 }
 0x201   :  { %1208 = vmatprep.subr.bf16.mxu0 %v1459_v0 }
 0x204   :  { %1209 = vmatpush3.bf16.msra.mxu0 %v1324_v4 }
 0x205   :  { %1210 = vmatprep.subr.bf16.mxu0 %v1459_v0 }
 0x208   :  { %1211 = vmatpush3.bf16.msra.mxu0 %v1325_v5 }
 0x209   :  { %1212 = vmatprep.subr.bf16.mxu0 %v1459_v0 }
 0x20c   :  { %1213 = vmatpush3.bf16.msra.mxu0 %v1326_v6 }
 0x20d   :  { %1214 = vmatprep.subr.bf16.mxu0 %v1459_v0 }
 0x210   :  { %1215 = vmatpush3.bf16.msra.mxu0 %v1327_v7 }
 0x211   :  { %1240 = vmatprep.subr.bf16.mxu0 %v1459_v0 }
 0x2b3   :  { %v407_v57 = vpop.f32.mrf.mxu0 }
 0x2b4   :  { %v408_v58 = vadd.f32 %v995_v56, %v407_v57  ;;  %v1350_v56 = vld [vmem:[#allocation7 + $0xc8] sm:$0xff]   ;;  %v1351_v57 = vld [vmem:[#allocation7 + $0xc0] sm:$0xff]  }
 0x2b5   :  { %v1178_v59 = vpop.f32.mrf.mxu0 }
 0x2b6   :  { %1356 = vtanh.f32 %v408_v58  ;;  %v1031_v58 = vld [vmem:[%s1619_s3 + $0x3] ss:$0 sm:$0xff]  ;;  %s1428_s3 = scalar_lea.vmem %s968_s12, 128 }
 0x2b7   :  { %v410_v60 = vpop.f32.mrf.mxu0  ;;  %p1429_p1 = scmp.ne.s32.totalorder %s968_s12, %s1428_s3  ;;  %p1434_p3 = scmp.lt.s32.totalorder %s1428_s3, %s1428_s3 }
 0x2b9   :  { %v1179_v61 = vpop.f32.mrf.mxu0  ;;  %p1435_p4 = por %p1434_p3, %p1433_p2 }
 0x2bb   :  { %p1436_p5 = pnand %p1435_p4, %p1429_p1 }
 0x2c3   :  { %v1357_v62 = vpop.eup %1356 }
 0x2c4   :  { %v414_v63 = vmul.f32 0.1, %v1357_v62 }
 0x2c6   :  { %v1563_v1 = vsub.f32 %v1530_v30, %v414_v63 }
 0x2c8   :  { %v416_v2 = vpack.c.bf16 %v1563_v1, %v1563_v1 }
 0x2ca   :  { %1197 = vmatmul.mubr.bf16.vlgmr.msra.gmra.mxu1 %v416_v2 }
 0x2cb   :  { %1236 = vmatprep.mubr.msk.bf16.mxu1 %vm1460_vm0, %v1459_v0  ;;  %1221 = vmatpush3.bf16.msra.mxu1 %v1328_v8 }
 0x2cc   :  { %1222 = vmatprep.subr.bf16.mxu1 %v1459_v0 }
 0x2cf   :  { %1223 = vmatpush3.bf16.msra.mxu1 %v1329_v9 }
 0x2d0   :  { %1224 = vmatprep.subr.bf16.mxu1 %v1459_v0 }
 0x2d3   :  { %1225 = vmatpush3.bf16.msra.mxu1 %v1330_v18 }
 0x2d4   :  { %1226 = vmatprep.subr.bf16.mxu1 %v1459_v0 }
 0x2d7   :  { %1227 = vmatpush3.bf16.msra.mxu1 %v1331_v19 }
 0x2d8   :  { %1228 = vmatprep.subr.bf16.mxu1 %v1459_v0 }
 0x2db   :  { %1229 = vmatpush3.bf16.msra.mxu1 %v1332_v20 }
 0x2dc   :  { %1230 = vmatprep.subr.bf16.mxu1 %v1459_v0 }
 0x2df   :  { %1231 = vmatpush3.bf16.msra.mxu1 %v1333_v21 }
 0x2e0   :  { %1232 = vmatprep.subr.bf16.mxu1 %v1459_v0 }
 0x2e3   :  { %1233 = vmatpush3.bf16.msra.mxu1 %v1334_v22 }
 0x2e4   :  { %1234 = vmatprep.subr.bf16.mxu1 %v1459_v0 }
 0x2e7   :  { %1235 = vmatpush3.bf16.msra.mxu1 %v1335_v23 }
 0x2e8   :  { %1260 = vmatprep.subr.bf16.mxu1 %v1459_v0 }
 0x38a   :  { %v499_v10 = vpop.f32.mrf.mxu1 }
 0x38b   :  { %1358 = vtanh.f32 %v499_v10 }
 0x38c   :  { %v1198_v11 = vpop.f32.mrf.mxu1 }
 0x38e   :  { %v502_v12 = vpop.f32.mrf.mxu1 }
 0x390   :  { %v1199_v13 = vpop.f32.mrf.mxu1 }
 0x398   :  { %v1359_v14 = vpop.eup %1358 }
 0x399   :  { %v506_v15 = vmul.f32 0.1, %v1359_v14 }
 0x39b   :  { %v1577_v16 = vadd.f32 %v506_v15, %v1544_v45 }
 0x39d   :  { %v544_v17 = vpack.c.bf16 %v1577_v16, %v1577_v16 }
 0x39f   :  { %1217 = vmatmul.mubr.bf16.vlgmr.msra.gmra.mxu0 %v544_v17 }
 0x3a0   :  { %1256 = vmatprep.mubr.msk.bf16.mxu0 %vm1460_vm0, %v1459_v0  ;;  %1241 = vmatpush3.bf16.msra.mxu0 %v1336_v24 }
 0x3a1   :  { %1242 = vmatprep.subr.bf16.mxu0 %v1459_v0 }
 0x3a4   :  { %1243 = vmatpush3.bf16.msra.mxu0 %v1337_v25 }
 0x3a5   :  { %1244 = vmatprep.subr.bf16.mxu0 %v1459_v0 }
 0x3a8   :  { %1245 = vmatpush3.bf16.msra.mxu0 %v1338_v26 }
 0x3a9   :  { %1246 = vmatprep.subr.bf16.mxu0 %v1459_v0 }
 0x3ac   :  { %1247 = vmatpush3.bf16.msra.mxu0 %v1339_v37 }
 0x3ad   :  { %1248 = vmatprep.subr.bf16.mxu0 %v1459_v0 }
 0x3b0   :  { %1249 = vmatpush3.bf16.msra.mxu0 %v1340_v38 }
 0x3b1   :  { %1250 = vmatprep.subr.bf16.mxu0 %v1459_v0 }
 0x3b4   :  { %1251 = vmatpush3.bf16.msra.mxu0 %v1341_v39 }
 0x3b5   :  { %1252 = vmatprep.subr.bf16.mxu0 %v1459_v0 }
 0x3b8   :  { %1253 = vmatpush3.bf16.msra.mxu0 %v1342_v40 }
 0x3b9   :  { %1254 = vmatprep.subr.bf16.mxu0 %v1459_v0 }
 0x3bc   :  { %1255 = vmatpush3.bf16.msra.mxu0 %v1343_v41 }
 0x45f   :  { %v633_v28 = vpop.f32.mrf.mxu0 }
 0x460   :  { %v634_v29 = vadd.f32 %v1013_v27, %v633_v28 }
 0x461   :  { %v1218_v30 = vpop.f32.mrf.mxu0 }
 0x462   :  { %1360 = vtanh.f32 %v634_v29 }
 0x463   :  { %v636_v31 = vpop.f32.mrf.mxu0 }
 0x465   :  { %v1219_v32 = vpop.f32.mrf.mxu0 }
 0x46f   :  { %v1361_v33 = vpop.eup %1360 }
 0x470   :  { %v640_v34 = vmul.f32 0.1, %v1361_v33 }
 0x472   :  { %v641_v35 = vsub.f32 %v1563_v1, %v640_v34 }
 0x474   :  { %v642_v36 = vpack.c.bf16 %v641_v35, %v641_v35 }
 0x476   :  { %1237 = vmatmul.mubr.bf16.vlgmr.msra.gmra.mxu1 %v642_v36 }
 0x477   :  { %1276 = vmatprep.mubr.msk.bf16.mxu1 %vm1460_vm0, %v1459_v0  ;;  %1261 = vmatpush3.bf16.msra.mxu1 %v1344_v42 }
 0x478   :  { %1262 = vmatprep.subr.bf16.mxu1 %v1459_v0 }
 0x47b   :  { %1263 = vmatpush3.bf16.msra.mxu1 %v1345_v43 }
 0x47c   :  { %1264 = vmatprep.subr.bf16.mxu1 %v1459_v0 }
 0x47f   :  { %1265 = vmatpush3.bf16.msra.mxu1 %v1346_v52 }
 0x480   :  { %1266 = vmatprep.subr.bf16.mxu1 %v1459_v0 }
 0x483   :  { %1267 = vmatpush3.bf16.msra.mxu1 %v1347_v53 }
 0x484   :  { %1268 = vmatprep.subr.bf16.mxu1 %v1459_v0 }
 0x487   :  { %1269 = vmatpush3.bf16.msra.mxu1 %v1348_v54 }
 0x488   :  { %1270 = vmatprep.subr.bf16.mxu1 %v1459_v0 }
 0x48b   :  { %1271 = vmatpush3.bf16.msra.mxu1 %v1349_v55 }
 0x48c   :  { %1272 = vmatprep.subr.bf16.mxu1 %v1459_v0 }
 0x48f   :  { %1273 = vmatpush3.bf16.msra.mxu1 %v1350_v56 }
 0x490   :  { %1274 = vmatprep.subr.bf16.mxu1 %v1459_v0 }
 0x493   :  { %1275 = vmatpush3.bf16.msra.mxu1 %v1351_v57 }
 0x536   :  { %v725_v44 = vpop.f32.mrf.mxu1 }
 0x537   :  { %1362 = vtanh.f32 %v725_v44 }
 0x538   :  { %v1238_v45 = vpop.f32.mrf.mxu1 }
 0x53a   :  { %v728_v46 = vpop.f32.mrf.mxu1 }
 0x53c   :  { %v1239_v47 = vpop.f32.mrf.mxu1 }
 0x544   :  { %v1363_v48 = vpop.eup %1362 }
 0x545   :  { %v732_v49 = vmul.f32 0.1, %v1363_v48 }
 0x547   :  { %v733_v50 = vadd.f32 %v732_v49, %v1577_v16 }
 0x549   :  { %v770_v51 = vpack.c.bf16 %v733_v50, %v733_v50 }
 0x54b   :  { %1257 = vmatmul.mubr.bf16.vlgmr.msra.gmra.mxu0 %v770_v51 }
 0x60b   :  { %v859_v59 = vpop.f32.mrf.mxu0 }
 0x60c   :  { %v860_v60 = vadd.f32 %v1031_v58, %v859_v59 }
 0x60d   :  { %v1258_v61 = vpop.f32.mrf.mxu0 }
 0x60e   :  { %1364 = vtanh.f32 %v860_v60 }
 0x60f   :  { %v862_v62 = vpop.f32.mrf.mxu0 }
 0x611   :  { %v1259_v63 = vpop.f32.mrf.mxu0 }
 0x61b   :  { %v1365_v1 = vpop.eup %1364 }
 0x61c   :  { %v866_v2 = vmul.f32 0.1, %v1365_v1 }
 0x61e   :  { %v867_v3 = vsub.f32 %v641_v35, %v866_v2 }
 0x620   :  { %v868_v4 = vpack.c.bf16 %v867_v3, %v867_v3 }
 0x622   :  { %1277 = vmatmul.mubr.bf16.vlgmr.msra.gmra.mxu1 %v868_v4 }
 0x6e2   :  { %v951_v5 = vpop.f32.mrf.mxu1 }
 0x6e3   :  { %1366 = vtanh.f32 %v951_v5 }
 0x6e4   :  { %v1278_v0 = vpop.f32.mrf.mxu1 }
 0x6e6   :  { %v954_v6 = vpop.f32.mrf.mxu1 }
 0x6e8   :  { %v1279_v7 = vpop.f32.mrf.mxu1 }
 0x6f0   :  { %v1367_v8 = vpop.eup %1366 }
 0x6f1   :  { %v958_v9 = vmul.f32 0.1, %v1367_v8 }
 0x6f3   :  { %v959_v10 = vadd.f32 %v958_v9, %v733_v50 }
 0x6f5   :  { %960 = vst [vmem:[#allocation8] sm:$0xff] %v959_v10 }
 0x6f6   :  { %1439 = shalt.err (!%p1436_p5)
}
 0x6f7   :  { %970 = dma.vmem_to_hbm [thread:$0]  %s968_s12, 128, %s1620_s4, [#allocation4]  }
 0x6f8   :  { %1452 = dma.done.wait [#allocation4], 128  }
 0x6f9   :  { %1453 = vsyncadd [#allocation4], 4294967168 }
 0x6fa   :  { %974 = vsyncpa [#allocation3], 1 }
 0x6fb   :  { %975 = vsyncpa [#allocation6], 1 }
 0x6fc   :  { %976 = vsyncpa [#allocation4], 1 }

</bundles_post_ra>
